<compile_context>
chip_gen: v5e
topology: v5e:2x2
jax: 0.10.0
libtpu: 0.0.40
codegen_flags: <defaults>
</compile_context>

<pallas_src>
import numpy as np
import jax
import jax.numpy as jnp
from jax.experimental import pallas as pl
from jax.experimental.pallas import tpu as pltpu

_BN_EPS = 1e-5
_INV_SQRT2 = 0.7071067811865476


# ----------------------------- in-kernel helpers -----------------------------
def _erf(x):
    # erf via Abramowitz & Stegun 7.1.26 (|abs err| < 1.5e-7); keeps the exact
    # (erf-based) PyTorch nn.GELU() semantics to fp32-level accuracy.
    a1, a2, a3, a4, a5 = 0.254829592, -0.284496736, 1.421413741, -1.453152027, 1.061405429
    p = 0.3275911
    ax = jnp.abs(x)
    t = 1.0 / (1.0 + p * ax)
    poly = ((((a5 * t + a4) * t + a3) * t + a2) * t + a1) * t
    y = 1.0 - poly * jnp.exp(-ax * ax)
    return jnp.where(x >= 0, y, -y)


def _gelu_exact(x):
    return 0.5 * x * (1.0 + _erf(x * _INV_SQRT2))


# ------------------------------- fused kernel -------------------------------
def _make_encoder_kernel(n_blocks, bt_per_block):
    """bt_per_block[i] = float(B * T_out_i) — BatchNorm normalizer per block."""

    def kernel(*refs):
        # layout: x, [A, R, b_f, rb_f, g_f, be_f, S, ST] * n_blocks, fc_w, fc_b, out
        x_ref = refs[0]
        fc_w_ref = refs[1 + 8 * n_blocks]
        fc_b_ref = refs[2 + 8 * n_blocks]
        out_ref = refs[-1]

        h = x_ref[...]                                            # (B, C0*T0) lane-dense
        for i in range(n_blocks):
            A, R, b_f, rb_f, g_f, be_f, S, ST = refs[1 + 8 * i: 1 + 8 * (i + 1)]
            inv_n = 1.0 / bt_per_block[i]

            # AdaptiveAvgPool1d + Conv1d(k=3,'same')  folded into one matmul,
            # AdaptiveAvgPool1d + Conv1d(k=1) residual into another.
            conv = jnp.dot(h, A[...], preferred_element_type=jnp.float32) + b_f[...]
            res = jnp.dot(h, R[...], preferred_element_type=jnp.float32) + rb_f[...]

            # BatchNorm1d — training-mode batch stats over (batch, time).
            col_sum = jnp.sum(conv, axis=0, keepdims=True)                            # (1, C*T)
            mean_c = jnp.dot(col_sum, S[...], preferred_element_type=jnp.float32) * inv_n   # (1, C)
            mean_f = jnp.dot(mean_c, ST[...], preferred_element_type=jnp.float32)           # (1, C*T)
            d = conv - mean_f
            sq_sum = jnp.sum(d * d, axis=0, keepdims=True)
            var_c = jnp.dot(sq_sum, S[...], preferred_element_type=jnp.float32) * inv_n
            inv_c = jax.lax.rsqrt(var_c + _BN_EPS)
            inv_f = jnp.dot(inv_c, ST[...], preferred_element_type=jnp.float32)

            y = _gelu_exact(d * inv_f * g_f[...] + be_f[...])
            h = y + res                                           # stays lane-dense (B, C*T)

        # FeatureToLatent: Flatten (already flat, PyTorch c*T+t order) + Linear.
        out_ref[...] = (
            jnp.dot(h, fc_w_ref[...], preferred_element_type=jnp.float32) + fc_b_ref[...]
        )

    return kernel


def encoder_forward(folded, x):
    """x: (B, C0, T0) float32 -> (B, latent_dim) float32.  Single pallas_call."""
    B = x.shape[0]
    x_flat = x.reshape(B, -1)
    n_blocks = len(folded["blocks"])
    latent = folded["fc_w"].shape[1]

    inputs = [x_flat]
    bt = []
    for blk in folded["blocks"]:
        inputs += [blk["A"], blk["R"], blk["b_f"], blk["rb_f"],
                   blk["g_f"], blk["be_f"], blk["S"], blk["ST"]]
        ct, c = blk["S"].shape
        bt.append(float(B * (ct // c)))
    inputs += [folded["fc_w"], folded["fc_b"]]

    kernel = _make_encoder_kernel(n_blocks, bt)
    return pl.pallas_call(
        kernel,
        out_shape=jax.ShapeDtypeStruct((B, latent), jnp.float32),
        in_specs=[pl.BlockSpec(memory_space=pltpu.MemorySpace.VMEM)] * len(inputs),
        out_specs=pl.BlockSpec(memory_space=pltpu.MemorySpace.VMEM),
    )(*inputs)


encoder_forward_jit = jax.jit(encoder_forward)


# ------------------------------ host-side prep ------------------------------
def adaptive_pool_matrix(t_in, t_out):
    # Matches torch nn.AdaptiveAvgPool1d: start=floor(j*Tin/Tout), end=ceil((j+1)*Tin/Tout)
    P = np.zeros((t_in, t_out), np.float32)
    for j in range(t_out):
        start = (j * t_in) // t_out
        end = ((j + 1) * t_in + t_out - 1) // t_out
        P[start:end, j] = 1.0 / (end - start)
    return P


def shift_cols(M, shift):
    # result[:, t] = M[:, t + shift] with zero fill (conv taps at t-1 / t+1)
    out = np.zeros_like(M)
    if shift == -1:
        out[:, 1:] = M[:, :-1]
    elif shift == 1:
        out[:, :-1] = M[:, 1:]
    else:
        out[:] = M
    return out


def init_encoder_params(key, latent_dim, channels, timesteps, kernel_size=3):
    """Raw PyTorch-layout parameters."""
    blocks = []
    for i in range(len(channels) - 1):
        cin, cout = channels[i], channels[i + 1]
        key, kw, kb, kr, krb = jax.random.split(key, 5)
        w = jax.random.normal(kw, (cout, cin, kernel_size), jnp.float32) / np.sqrt(cin * kernel_size)
        b = jax.random.normal(kb, (cout,), jnp.float32) * 0.1
        if cin != cout:
            wr = jax.random.normal(kr, (cout, cin), jnp.float32) / np.sqrt(cin)
            rb = jax.random.normal(krb, (cout,), jnp.float32) * 0.1
        else:  # nn.Identity()
            wr = jnp.eye(cout, dtype=jnp.float32)
            rb = jnp.zeros((cout,), jnp.float32)
        blocks.append(dict(w=w, b=b, wr=wr, rb=rb,
                           gamma=jnp.ones((cout,), jnp.float32),
                           beta=jnp.zeros((cout,), jnp.float32)))
    c_last, t_last = channels[-1], timesteps[-1]
    key, kfw, kfb = jax.random.split(key, 3)
    fc_w = jax.random.normal(kfw, (latent_dim, c_last * t_last), jnp.float32) / np.sqrt(c_last * t_last)
    fc_b = jax.random.normal(kfb, (latent_dim,), jnp.float32) * 0.1
    return dict(blocks=blocks, fc_w=fc_w, fc_b=fc_b)


def fold_params(raw, channels, timesteps):
    """Pre-fold pooling + conv taps into per-block Kronecker operators (done ONCE)."""
    folded = {"blocks": [],
              "fc_w": jnp.asarray(np.asarray(raw["fc_w"]).T),          # (C*T, latent)
              "fc_b": jnp.asarray(np.asarray(raw["fc_b"])[None, :])}   # (1, latent)
    for i, blk in enumerate(raw["blocks"]):
        cin, cout = channels[i], channels[i + 1]
        t_in, t_out = timesteps[i], timesteps[i + 1]
        w = np.asarray(blk["w"])      # (C_out, C_in, 3)
        b = np.asarray(blk["b"])      # (C_out,)
        wr = np.asarray(blk["wr"])    # (C_out, C_in)
        rb = np.asarray(blk["rb"])    # (C_out,)
        gamma = np.asarray(blk["gamma"])
        beta = np.asarray(blk["beta"])

        P = adaptive_pool_matrix(t_in, t_out)
        Pstack = np.stack([shift_cols(P, -1), P, shift_cols(P, +1)], axis=0)  # (3, T_in, T_out)

        # A[(ci,i),(co,t)] = sum_k w[co,ci,k] * P_k[i,t]   (pool ∘ conv k=3 'same')
        A = np.einsum('ock,kit->ciot', w, Pstack).reshape(cin * t_in, cout * t_out)
        # R[(ci,i),(co,t)] = wr[co,ci] * P[i,t]            (pool ∘ 1x1 residual)
        R = np.einsum('oc,it->ciot', wr, P).reshape(cin * t_in, cout * t_out)

        S = np.kron(np.eye(cout, dtype=np.float32), np.ones((t_out, 1), np.float32))  # (C*T, C)

        folded["blocks"].append(dict(
            A=jnp.asarray(A.astype(np.float32)),
            R=jnp.asarray(R.astype(np.float32)),
            b_f=jnp.asarray(np.repeat(b, t_out)[None, :].astype(np.float32)),
            rb_f=jnp.asarray(np.repeat(rb, t_out)[None, :].astype(np.float32)),
            g_f=jnp.asarray(np.repeat(gamma, t_out)[None, :].astype(np.float32)),
            be_f=jnp.asarray(np.repeat(beta, t_out)[None, :].astype(np.float32)),
            S=jnp.asarray(S),
            ST=jnp.asarray(S.T.copy()),
        ))
    return folded


# ------------------------- pure-JAX reference (check) -------------------------
def ref_forward(raw, x, channels, timesteps):
    h = x
    for i, blk in enumerate(raw["blocks"]):
        t_in, t_out = timesteps[i], timesteps[i + 1]
        P = jnp.asarray(adaptive_pool_matrix(t_in, t_out))
        h = jnp.einsum('bct,ts->bcs', h, P)                              # AdaptiveAvgPool1d
        res = jnp.einsum('oc,bct->bot', blk["wr"], h) + blk["rb"][None, :, None]
        hp = jnp.pad(h, ((0, 0), (0, 0), (1, 1)))
        w = blk["w"]
        conv = (jnp.einsum('oc,bct->bot', w[:, :, 0], hp[:, :, 0:t_out])
                + jnp.einsum('oc,bct->bot', w[:, :, 1], hp[:, :, 1:t_out + 1])
                + jnp.einsum('oc,bct->bot', w[:, :, 2], hp[:, :, 2:t_out + 2])
                + blk["b"][None, :, None])
        mean = conv.mean(axis=(0, 2), keepdims=True)
        var = ((conv - mean) ** 2).mean(axis=(0, 2), keepdims=True)
        xn = (conv - mean) / jnp.sqrt(var + _BN_EPS)
        y = jax.nn.gelu(xn * blk["gamma"][None, :, None] + blk["beta"][None, :, None],
                        approximate=False)
        h = y + res
    hf = h.reshape(h.shape[0], -1)
    return hf @ raw["fc_w"].T + raw["fc_b"][None, :]


# ----------------------------------- main -----------------------------------
if __name__ == "__main__":
    # Small config consistent with the module:
    #   input (B, 4, 32), channels [4, 8, 16], timesteps [32, 16, 8], latent 32
    B = 2
    channels = [4, 8, 16]
    timesteps = [32, 16, 8]
    latent_dim = 32
    input_shape = (B, channels[0], timesteps[0])   # (2, 4, 32)

    key = jax.random.PRNGKey(0)
    key, kx = jax.random.split(key)
    x = jax.random.normal(kx, input_shape, jnp.float32)

    raw = init_encoder_params(key, latent_dim, channels, timesteps, kernel_size=3)
    folded = fold_params(raw, channels, timesteps)   # host-side fold, done once

    out = encoder_forward_jit(folded, x)
    out = jax.block_until_ready(out)

    assert out.shape == (B, latent_dim), out.shape
    assert bool(jnp.all(jnp.isfinite(out)))

    ref = ref_forward(raw, x, channels, timesteps)
    assert bool(jnp.allclose(out, ref, atol=2e-4, rtol=2e-3)), (
        float(jnp.max(jnp.abs(out - ref))))

    print("KERNEL_OK")
</pallas_src>

<mosaic_0001>
module attributes {stable_mosaic.version = 11 : i64} {
  func.func @kernel(%arg0: memref<2x128xf32, #tpu.memory_space<vmem>>, %arg1: memref<128x128xf32, #tpu.memory_space<vmem>>, %arg2: memref<128x128xf32, #tpu.memory_space<vmem>>, %arg3: memref<1x128xf32, #tpu.memory_space<vmem>>, %arg4: memref<1x128xf32, #tpu.memory_space<vmem>>, %arg5: memref<1x128xf32, #tpu.memory_space<vmem>>, %arg6: memref<1x128xf32, #tpu.memory_space<vmem>>, %arg7: memref<128x8xf32, #tpu.memory_space<vmem>>, %arg8: memref<8x128xf32, #tpu.memory_space<vmem>>, %arg9: memref<128x128xf32, #tpu.memory_space<vmem>>, %arg10: memref<128x128xf32, #tpu.memory_space<vmem>>, %arg11: memref<1x128xf32, #tpu.memory_space<vmem>>, %arg12: memref<1x128xf32, #tpu.memory_space<vmem>>, %arg13: memref<1x128xf32, #tpu.memory_space<vmem>>, %arg14: memref<1x128xf32, #tpu.memory_space<vmem>>, %arg15: memref<128x16xf32, #tpu.memory_space<vmem>>, %arg16: memref<16x128xf32, #tpu.memory_space<vmem>>, %arg17: memref<128x32xf32, #tpu.memory_space<vmem>>, %arg18: memref<1x32xf32, #tpu.memory_space<vmem>>, %arg19: memref<2x32xf32, #tpu.memory_space<vmem>>) attributes {dimension_semantics = [], scalar_prefetch = 0 : i64, scratch_operands = 0 : i64, tpu.core_type = #tpu.core_type<tc>} {
    %c0 = arith.constant 0 : index
    %c0_0 = arith.constant 0 : index
    %0 = vector.load %arg0[%c0, %c0_0] : memref<2x128xf32, #tpu.memory_space<vmem>>, vector<2x128xf32>
    %c0_1 = arith.constant 0 : index
    %c0_2 = arith.constant 0 : index
    %1 = vector.load %arg1[%c0_1, %c0_2] : memref<128x128xf32, #tpu.memory_space<vmem>>, vector<128x128xf32>
    %cst = arith.constant dense<0.000000e+00> : vector<2x128xf32>
    %2 = tpu.matmul %0, %1, %cst {dimension_numbers = #tpu.dot_dimension_numbers<[1], [0], [0], [1], [0, 0, 1, 1], [], []>} : vector<2x128xf32>, vector<128x128xf32>, vector<2x128xf32> -> vector<2x128xf32>
    %c0_3 = arith.constant 0 : index
    %c0_4 = arith.constant 0 : index
    %3 = vector.load %arg3[%c0_3, %c0_4] : memref<1x128xf32, #tpu.memory_space<vmem>>, vector<1x128xf32>
    %4 = vector.broadcast %3 : vector<1x128xf32> to vector<2x128xf32>
    %5 = arith.addf %2, %4 : vector<2x128xf32>
    %c0_5 = arith.constant 0 : index
    %c0_6 = arith.constant 0 : index
    %6 = vector.load %arg2[%c0_5, %c0_6] : memref<128x128xf32, #tpu.memory_space<vmem>>, vector<128x128xf32>
    %cst_7 = arith.constant dense<0.000000e+00> : vector<2x128xf32>
    %7 = tpu.matmul %0, %6, %cst_7 {dimension_numbers = #tpu.dot_dimension_numbers<[1], [0], [0], [1], [0, 0, 1, 1], [], []>} : vector<2x128xf32>, vector<128x128xf32>, vector<2x128xf32> -> vector<2x128xf32>
    %c0_8 = arith.constant 0 : index
    %c0_9 = arith.constant 0 : index
    %8 = vector.load %arg4[%c0_8, %c0_9] : memref<1x128xf32, #tpu.memory_space<vmem>>, vector<1x128xf32>
    %9 = vector.broadcast %8 : vector<1x128xf32> to vector<2x128xf32>
    %10 = arith.addf %7, %9 : vector<2x128xf32>
    %cst_10 = arith.constant dense<0.000000e+00> : vector<128xf32>
    %11 = vector.multi_reduction <add>, %5, %cst_10 [0] : vector<2x128xf32> to vector<128xf32>
    %12 = vector.shape_cast %11 : vector<128xf32> to vector<1x128xf32>
    %c0_11 = arith.constant 0 : index
    %c0_12 = arith.constant 0 : index
    %13 = vector.load %arg7[%c0_11, %c0_12] : memref<128x8xf32, #tpu.memory_space<vmem>>, vector<128x8xf32>
    %cst_13 = arith.constant dense<0.000000e+00> : vector<1x8xf32>
    %14 = tpu.matmul %12, %13, %cst_13 {dimension_numbers = #tpu.dot_dimension_numbers<[1], [0], [0], [1], [0, 0, 1, 1], [], []>} : vector<1x128xf32>, vector<128x8xf32>, vector<1x8xf32> -> vector<1x8xf32>
    %cst_14 = arith.constant 3.125000e-02 : f32
    %15 = vector.broadcast %cst_14 : f32 to vector<1x8xf32>
    %16 = arith.mulf %14, %15 : vector<1x8xf32>
    %c0_15 = arith.constant 0 : index
    %c0_16 = arith.constant 0 : index
    %17 = vector.load %arg8[%c0_15, %c0_16] : memref<8x128xf32, #tpu.memory_space<vmem>>, vector<8x128xf32>
    %cst_17 = arith.constant dense<0.000000e+00> : vector<1x128xf32>
    %18 = tpu.matmul %16, %17, %cst_17 {dimension_numbers = #tpu.dot_dimension_numbers<[1], [0], [0], [1], [0, 0, 1, 1], [], []>} : vector<1x8xf32>, vector<8x128xf32>, vector<1x128xf32> -> vector<1x128xf32>
    %19 = vector.broadcast %18 : vector<1x128xf32> to vector<2x128xf32>
    %20 = arith.subf %5, %19 : vector<2x128xf32>
    %21 = arith.mulf %20, %20 : vector<2x128xf32>
    %cst_18 = arith.constant dense<0.000000e+00> : vector<128xf32>
    %22 = vector.multi_reduction <add>, %21, %cst_18 [0] : vector<2x128xf32> to vector<128xf32>
    %23 = vector.shape_cast %22 : vector<128xf32> to vector<1x128xf32>
    %c0_19 = arith.constant 0 : index
    %c0_20 = arith.constant 0 : index
    %24 = vector.load %arg7[%c0_19, %c0_20] : memref<128x8xf32, #tpu.memory_space<vmem>>, vector<128x8xf32>
    %cst_21 = arith.constant dense<0.000000e+00> : vector<1x8xf32>
    %25 = tpu.matmul %23, %24, %cst_21 {dimension_numbers = #tpu.dot_dimension_numbers<[1], [0], [0], [1], [0, 0, 1, 1], [], []>} : vector<1x128xf32>, vector<128x8xf32>, vector<1x8xf32> -> vector<1x8xf32>
    %cst_22 = arith.constant 3.125000e-02 : f32
    %26 = vector.broadcast %cst_22 : f32 to vector<1x8xf32>
    %27 = arith.mulf %25, %26 : vector<1x8xf32>
    %cst_23 = arith.constant 9.99999974E-6 : f32
    %28 = vector.broadcast %cst_23 : f32 to vector<1x8xf32>
    %29 = arith.addf %27, %28 : vector<1x8xf32>
    %30 = math.rsqrt %29 : vector<1x8xf32>
    %c0_24 = arith.constant 0 : index
    %c0_25 = arith.constant 0 : index
    %31 = vector.load %arg8[%c0_24, %c0_25] : memref<8x128xf32, #tpu.memory_space<vmem>>, vector<8x128xf32>
    %cst_26 = arith.constant dense<0.000000e+00> : vector<1x128xf32>
    %32 = tpu.matmul %30, %31, %cst_26 {dimension_numbers = #tpu.dot_dimension_numbers<[1], [0], [0], [1], [0, 0, 1, 1], [], []>} : vector<1x8xf32>, vector<8x128xf32>, vector<1x128xf32> -> vector<1x128xf32>
    %33 = vector.broadcast %32 : vector<1x128xf32> to vector<2x128xf32>
    %34 = arith.mulf %20, %33 : vector<2x128xf32>
    %c0_27 = arith.constant 0 : index
    %c0_28 = arith.constant 0 : index
    %35 = vector.load %arg5[%c0_27, %c0_28] : memref<1x128xf32, #tpu.memory_space<vmem>>, vector<1x128xf32>
    %36 = vector.broadcast %35 : vector<1x128xf32> to vector<2x128xf32>
    %37 = arith.mulf %34, %36 : vector<2x128xf32>
    %c0_29 = arith.constant 0 : index
    %c0_30 = arith.constant 0 : index
    %38 = vector.load %arg6[%c0_29, %c0_30] : memref<1x128xf32, #tpu.memory_space<vmem>>, vector<1x128xf32>
    %39 = vector.broadcast %38 : vector<1x128xf32> to vector<2x128xf32>
    %40 = arith.addf %37, %39 : vector<2x128xf32>
    %cst_31 = arith.constant 5.000000e-01 : f32
    %41 = vector.broadcast %cst_31 : f32 to vector<2x128xf32>
    %42 = arith.mulf %41, %40 : vector<2x128xf32>
    %cst_32 = arith.constant 0.707106769 : f32
    %43 = vector.broadcast %cst_32 : f32 to vector<2x128xf32>
    %44 = arith.mulf %40, %43 : vector<2x128xf32>
    %45 = math.absf %44 : vector<2x128xf32>
    %cst_33 = arith.constant 0.327591091 : f32
    %46 = vector.broadcast %cst_33 : f32 to vector<2x128xf32>
    %47 = arith.mulf %46, %45 : vector<2x128xf32>
    %cst_34 = arith.constant 1.000000e+00 : f32
    %48 = vector.broadcast %cst_34 : f32 to vector<2x128xf32>
    %49 = arith.addf %48, %47 : vector<2x128xf32>
    %cst_35 = arith.constant 1.000000e+00 : f32
    %50 = vector.broadcast %cst_35 : f32 to vector<2x128xf32>
    %51 = arith.divf %50, %49 : vector<2x128xf32>
    %cst_36 = arith.constant 1.06140542 : f32
    %52 = vector.broadcast %cst_36 : f32 to vector<2x128xf32>
    %53 = arith.mulf %52, %51 : vector<2x128xf32>
    %cst_37 = arith.constant -1.45315206 : f32
    %54 = vector.broadcast %cst_37 : f32 to vector<2x128xf32>
    %55 = arith.addf %53, %54 : vector<2x128xf32>
    %56 = arith.mulf %55, %51 : vector<2x128xf32>
    %cst_38 = arith.constant 1.42141378 : f32
    %57 = vector.broadcast %cst_38 : f32 to vector<2x128xf32>
    %58 = arith.addf %56, %57 : vector<2x128xf32>
    %59 = arith.mulf %58, %51 : vector<2x128xf32>
    %cst_39 = arith.constant -0.284496725 : f32
    %60 = vector.broadcast %cst_39 : f32 to vector<2x128xf32>
    %61 = arith.addf %59, %60 : vector<2x128xf32>
    %62 = arith.mulf %61, %51 : vector<2x128xf32>
    %cst_40 = arith.constant 0.254829586 : f32
    %63 = vector.broadcast %cst_40 : f32 to vector<2x128xf32>
    %64 = arith.addf %62, %63 : vector<2x128xf32>
    %65 = arith.mulf %64, %51 : vector<2x128xf32>
    %cst_41 = arith.constant 0.000000e+00 : f32
    %66 = vector.broadcast %cst_41 : f32 to vector<2x128xf32>
    %67 = arith.subf %66, %45 : vector<2x128xf32>
    %68 = arith.mulf %67, %45 : vector<2x128xf32>
    %69 = math.exp %68 : vector<2x128xf32>
    %70 = arith.mulf %65, %69 : vector<2x128xf32>
    %cst_42 = arith.constant 1.000000e+00 : f32
    %71 = vector.broadcast %cst_42 : f32 to vector<2x128xf32>
    %72 = arith.subf %71, %70 : vector<2x128xf32>
    %cst_43 = arith.constant 0.000000e+00 : f32
    %73 = vector.broadcast %cst_43 : f32 to vector<2x128xf32>
    %74 = arith.cmpf oge, %44, %73 : vector<2x128xf32>
    %cst_44 = arith.constant 0.000000e+00 : f32
    %75 = vector.broadcast %cst_44 : f32 to vector<2x128xf32>
    %76 = arith.subf %75, %72 : vector<2x128xf32>
    %77 = arith.select %74, %72, %76 : vector<2x128xi1>, vector<2x128xf32>
    %cst_45 = arith.constant 1.000000e+00 : f32
    %78 = vector.broadcast %cst_45 : f32 to vector<2x128xf32>
    %79 = arith.addf %78, %77 : vector<2x128xf32>
    %80 = arith.mulf %42, %79 : vector<2x128xf32>
    %81 = arith.addf %80, %10 : vector<2x128xf32>
    %c0_46 = arith.constant 0 : index
    %c0_47 = arith.constant 0 : index
    %82 = vector.load %arg9[%c0_46, %c0_47] : memref<128x128xf32, #tpu.memory_space<vmem>>, vector<128x128xf32>
    %cst_48 = arith.constant dense<0.000000e+00> : vector<2x128xf32>
    %83 = tpu.matmul %81, %82, %cst_48 {dimension_numbers = #tpu.dot_dimension_numbers<[1], [0], [0], [1], [0, 0, 1, 1], [], []>} : vector<2x128xf32>, vector<128x128xf32>, vector<2x128xf32> -> vector<2x128xf32>
    %c0_49 = arith.constant 0 : index
    %c0_50 = arith.constant 0 : index
    %84 = vector.load %arg11[%c0_49, %c0_50] : memref<1x128xf32, #tpu.memory_space<vmem>>, vector<1x128xf32>
    %85 = vector.broadcast %84 : vector<1x128xf32> to vector<2x128xf32>
    %86 = arith.addf %83, %85 : vector<2x128xf32>
    %c0_51 = arith.constant 0 : index
    %c0_52 = arith.constant 0 : index
    %87 = vector.load %arg10[%c0_51, %c0_52] : memref<128x128xf32, #tpu.memory_space<vmem>>, vector<128x128xf32>
    %cst_53 = arith.constant dense<0.000000e+00> : vector<2x128xf32>
    %88 = tpu.matmul %81, %87, %cst_53 {dimension_numbers = #tpu.dot_dimension_numbers<[1], [0], [0], [1], [0, 0, 1, 1], [], []>} : vector<2x128xf32>, vector<128x128xf32>, vector<2x128xf32> -> vector<2x128xf32>
    %c0_54 = arith.constant 0 : index
    %c0_55 = arith.constant 0 : index
    %89 = vector.load %arg12[%c0_54, %c0_55] : memref<1x128xf32, #tpu.memory_space<vmem>>, vector<1x128xf32>
    %90 = vector.broadcast %89 : vector<1x128xf32> to vector<2x128xf32>
    %91 = arith.addf %88, %90 : vector<2x128xf32>
    %cst_56 = arith.constant dense<0.000000e+00> : vector<128xf32>
    %92 = vector.multi_reduction <add>, %86, %cst_56 [0] : vector<2x128xf32> to vector<128xf32>
    %93 = vector.shape_cast %92 : vector<128xf32> to vector<1x128xf32>
    %c0_57 = arith.constant 0 : index
    %c0_58 = arith.constant 0 : index
    %94 = vector.load %arg15[%c0_57, %c0_58] : memref<128x16xf32, #tpu.memory_space<vmem>>, vector<128x16xf32>
    %cst_59 = arith.constant dense<0.000000e+00> : vector<1x16xf32>
    %95 = tpu.matmul %93, %94, %cst_59 {dimension_numbers = #tpu.dot_dimension_numbers<[1], [0], [0], [1], [0, 0, 1, 1], [], []>} : vector<1x128xf32>, vector<128x16xf32>, vector<1x16xf32> -> vector<1x16xf32>
    %cst_60 = arith.constant 6.250000e-02 : f32
    %96 = vector.broadcast %cst_60 : f32 to vector<1x16xf32>
    %97 = arith.mulf %95, %96 : vector<1x16xf32>
    %c0_61 = arith.constant 0 : index
    %c0_62 = arith.constant 0 : index
    %98 = vector.load %arg16[%c0_61, %c0_62] : memref<16x128xf32, #tpu.memory_space<vmem>>, vector<16x128xf32>
    %cst_63 = arith.constant dense<0.000000e+00> : vector<1x128xf32>
    %99 = tpu.matmul %97, %98, %cst_63 {dimension_numbers = #tpu.dot_dimension_numbers<[1], [0], [0], [1], [0, 0, 1, 1], [], []>} : vector<1x16xf32>, vector<16x128xf32>, vector<1x128xf32> -> vector<1x128xf32>
    %100 = vector.broadcast %99 : vector<1x128xf32> to vector<2x128xf32>
    %101 = arith.subf %86, %100 : vector<2x128xf32>
    %102 = arith.mulf %101, %101 : vector<2x128xf32>
    %cst_64 = arith.constant dense<0.000000e+00> : vector<128xf32>
    %103 = vector.multi_reduction <add>, %102, %cst_64 [0] : vector<2x128xf32> to vector<128xf32>
    %104 = vector.shape_cast %103 : vector<128xf32> to vector<1x128xf32>
    %c0_65 = arith.constant 0 : index
    %c0_66 = arith.constant 0 : index
    %105 = vector.load %arg15[%c0_65, %c0_66] : memref<128x16xf32, #tpu.memory_space<vmem>>, vector<128x16xf32>
    %cst_67 = arith.constant dense<0.000000e+00> : vector<1x16xf32>
    %106 = tpu.matmul %104, %105, %cst_67 {dimension_numbers = #tpu.dot_dimension_numbers<[1], [0], [0], [1], [0, 0, 1, 1], [], []>} : vector<1x128xf32>, vector<128x16xf32>, vector<1x16xf32> -> vector<1x16xf32>
    %cst_68 = arith.constant 6.250000e-02 : f32
    %107 = vector.broadcast %cst_68 : f32 to vector<1x16xf32>
    %108 = arith.mulf %106, %107 : vector<1x16xf32>
    %cst_69 = arith.constant 9.99999974E-6 : f32
    %109 = vector.broadcast %cst_69 : f32 to vector<1x16xf32>
    %110 = arith.addf %108, %109 : vector<1x16xf32>
    %111 = math.rsqrt %110 : vector<1x16xf32>
    %c0_70 = arith.constant 0 : index
    %c0_71 = arith.constant 0 : index
    %112 = vector.load %arg16[%c0_70, %c0_71] : memref<16x128xf32, #tpu.memory_space<vmem>>, vector<16x128xf32>
    %cst_72 = arith.constant dense<0.000000e+00> : vector<1x128xf32>
    %113 = tpu.matmul %111, %112, %cst_72 {dimension_numbers = #tpu.dot_dimension_numbers<[1], [0], [0], [1], [0, 0, 1, 1], [], []>} : vector<1x16xf32>, vector<16x128xf32>, vector<1x128xf32> -> vector<1x128xf32>
    %114 = vector.broadcast %113 : vector<1x128xf32> to vector<2x128xf32>
    %115 = arith.mulf %101, %114 : vector<2x128xf32>
    %c0_73 = arith.constant 0 : index
    %c0_74 = arith.constant 0 : index
    %116 = vector.load %arg13[%c0_73, %c0_74] : memref<1x128xf32, #tpu.memory_space<vmem>>, vector<1x128xf32>
    %117 = vector.broadcast %116 : vector<1x128xf32> to vector<2x128xf32>
    %118 = arith.mulf %115, %117 : vector<2x128xf32>
    %c0_75 = arith.constant 0 : index
    %c0_76 = arith.constant 0 : index
    %119 = vector.load %arg14[%c0_75, %c0_76] : memref<1x128xf32, #tpu.memory_space<vmem>>, vector<1x128xf32>
    %120 = vector.broadcast %119 : vector<1x128xf32> to vector<2x128xf32>
    %121 = arith.addf %118, %120 : vector<2x128xf32>
    %cst_77 = arith.constant 5.000000e-01 : f32
    %122 = vector.broadcast %cst_77 : f32 to vector<2x128xf32>
    %123 = arith.mulf %122, %121 : vector<2x128xf32>
    %cst_78 = arith.constant 0.707106769 : f32
    %124 = vector.broadcast %cst_78 : f32 to vector<2x128xf32>
    %125 = arith.mulf %121, %124 : vector<2x128xf32>
    %126 = math.absf %125 : vector<2x128xf32>
    %cst_79 = arith.constant 0.327591091 : f32
    %127 = vector.broadcast %cst_79 : f32 to vector<2x128xf32>
    %128 = arith.mulf %127, %126 : vector<2x128xf32>
    %cst_80 = arith.constant 1.000000e+00 : f32
    %129 = vector.broadcast %cst_80 : f32 to vector<2x128xf32>
    %130 = arith.addf %129, %128 : vector<2x128xf32>
    %cst_81 = arith.constant 1.000000e+00 : f32
    %131 = vector.broadcast %cst_81 : f32 to vector<2x128xf32>
    %132 = arith.divf %131, %130 : vector<2x128xf32>
    %cst_82 = arith.constant 1.06140542 : f32
    %133 = vector.broadcast %cst_82 : f32 to vector<2x128xf32>
    %134 = arith.mulf %133, %132 : vector<2x128xf32>
    %cst_83 = arith.constant -1.45315206 : f32
    %135 = vector.broadcast %cst_83 : f32 to vector<2x128xf32>
    %136 = arith.addf %134, %135 : vector<2x128xf32>
    %137 = arith.mulf %136, %132 : vector<2x128xf32>
    %cst_84 = arith.constant 1.42141378 : f32
    %138 = vector.broadcast %cst_84 : f32 to vector<2x128xf32>
    %139 = arith.addf %137, %138 : vector<2x128xf32>
    %140 = arith.mulf %139, %132 : vector<2x128xf32>
    %cst_85 = arith.constant -0.284496725 : f32
    %141 = vector.broadcast %cst_85 : f32 to vector<2x128xf32>
    %142 = arith.addf %140, %141 : vector<2x128xf32>
    %143 = arith.mulf %142, %132 : vector<2x128xf32>
    %cst_86 = arith.constant 0.254829586 : f32
    %144 = vector.broadcast %cst_86 : f32 to vector<2x128xf32>
    %145 = arith.addf %143, %144 : vector<2x128xf32>
    %146 = arith.mulf %145, %132 : vector<2x128xf32>
    %cst_87 = arith.constant 0.000000e+00 : f32
    %147 = vector.broadcast %cst_87 : f32 to vector<2x128xf32>
    %148 = arith.subf %147, %126 : vector<2x128xf32>
    %149 = arith.mulf %148, %126 : vector<2x128xf32>
    %150 = math.exp %149 : vector<2x128xf32>
    %151 = arith.mulf %146, %150 : vector<2x128xf32>
    %cst_88 = arith.constant 1.000000e+00 : f32
    %152 = vector.broadcast %cst_88 : f32 to vector<2x128xf32>
    %153 = arith.subf %152, %151 : vector<2x128xf32>
    %cst_89 = arith.constant 0.000000e+00 : f32
    %154 = vector.broadcast %cst_89 : f32 to vector<2x128xf32>
    %155 = arith.cmpf oge, %125, %154 : vector<2x128xf32>
    %cst_90 = arith.constant 0.000000e+00 : f32
    %156 = vector.broadcast %cst_90 : f32 to vector<2x128xf32>
    %157 = arith.subf %156, %153 : vector<2x128xf32>
    %158 = arith.select %155, %153, %157 : vector<2x128xi1>, vector<2x128xf32>
    %cst_91 = arith.constant 1.000000e+00 : f32
    %159 = vector.broadcast %cst_91 : f32 to vector<2x128xf32>
    %160 = arith.addf %159, %158 : vector<2x128xf32>
    %161 = arith.mulf %123, %160 : vector<2x128xf32>
    %162 = arith.addf %161, %91 : vector<2x128xf32>
    %c0_92 = arith.constant 0 : index
    %c0_93 = arith.constant 0 : index
    %163 = vector.load %arg17[%c0_92, %c0_93] : memref<128x32xf32, #tpu.memory_space<vmem>>, vector<128x32xf32>
    %cst_94 = arith.constant dense<0.000000e+00> : vector<2x32xf32>
    %164 = tpu.matmul %162, %163, %cst_94 {dimension_numbers = #tpu.dot_dimension_numbers<[1], [0], [0], [1], [0, 0, 1, 1], [], []>} : vector<2x128xf32>, vector<128x32xf32>, vector<2x32xf32> -> vector<2x32xf32>
    %c0_95 = arith.constant 0 : index
    %c0_96 = arith.constant 0 : index
    %165 = vector.load %arg18[%c0_95, %c0_96] : memref<1x32xf32, #tpu.memory_space<vmem>>, vector<1x32xf32>
    %166 = vector.broadcast %165 : vector<1x32xf32> to vector<2x32xf32>
    %167 = arith.addf %164, %166 : vector<2x32xf32>
    %c0_97 = arith.constant 0 : index
    %c0_98 = arith.constant 0 : index
    %168 = vector.load %arg19[%c0_97, %c0_98] : memref<2x32xf32, #tpu.memory_space<vmem>>, vector<2x32xf32>
    tpu.vector_store %arg19[%c0_97, %c0_98], %167 {strides = array<i32>} : memref<2x32xf32, #tpu.memory_space<vmem>>, vector<2x32xf32>,
    return
  }
}

</mosaic_0001>

<bundles_post_ra>
// kernel: encoder_forward.1
= control target key start
LH: loop header
LB: loop body
LE: loop exit
PB: predicated region body
PF: predicated region fallthrough
CT: control target
= control target key end

     0   :  { %s1288_s0 = inlined_call_operand.vmem [shape: f32[2,128], index: 0, kind: input, shape index: {}]   ;;  %s1289_s1 = inlined_call_operand.vmem [shape: f32[128,128], index: 1, kind: input, shape index: {}]   ;;  %s1290_s2 = inlined_call_operand.vmem [shape: f32[128,128], index: 2, kind: input, shape index: {}]   ;;  %s1291_s3 = inlined_call_operand.vmem [shape: f32[1,128], index: 3, kind: input, shape index: {}]   ;;  %s1292_s4 = inlined_call_operand.vmem [shape: f32[1,128], index: 4, kind: input, shape index: {}]   ;;  %s1293_s5 = inlined_call_operand.vmem [shape: f32[1,128], index: 5, kind: input, shape index: {}]   ;;  %s1294_s6 = inlined_call_operand.vmem [shape: f32[1,128], index: 6, kind: input, shape index: {}]   ;;  %s1295_s7 = inlined_call_operand.vmem [shape: f32[128,8], index: 7, kind: input, shape index: {}]   ;;  %s1296_s8 = inlined_call_operand.vmem [shape: f32[8,128], index: 8, kind: input, shape index: {}]   ;;  %s1297_s9 = inlined_call_operand.vmem [shape: f32[128,128], index: 9, kind: input, shape index: {}]   ;;  %s1298_s10 = inlined_call_operand.hbm [shape: f32[128,128], index: 10, kind: input, shape index: {}]   ;;  %s1299_s11 = inlined_call_operand.vmem [shape: f32[1,128], index: 11, kind: input, shape index: {}]   ;;  %s1300_s12 = inlined_call_operand.vmem [shape: f32[1,128], index: 12, kind: input, shape index: {}]   ;;  %s1301_s13 = inlined_call_operand.vmem [shape: f32[1,128], index: 13, kind: input, shape index: {}]   ;;  %s1302_s14 = inlined_call_operand.vmem [shape: f32[1,128], index: 14, kind: input, shape index: {}]   ;;  %s1303_s15 = inlined_call_operand.vmem [shape: f32[128,16], index: 15, kind: input, shape index: {}]   ;;  %s1304_s16 = inlined_call_operand.hbm [shape: f32[16,128], index: 16, kind: input, shape index: {}]   ;;  %s1305_s17 = inlined_call_operand.vmem [shape: f32[128,32], index: 17, kind: input, shape index: {}]   ;;  %s1306_s18 = inlined_call_operand.vmem [shape: f32[1,32], index: 18, kind: input, shape index: {}]   ;;  %s1307_s19 = inlined_call_operand.hbm [shape: f32[2,32], index: 19, kind: output, shape index: {}]  }
   0x1   :  { %1310 = sst [smem:[#allocation11_spill]] %s1288_s0 }
   0x2   :  { %1311 = sst [smem:[#allocation12_spill]] %s1289_s1 }
   0x3   :  { %1312 = sst [smem:[#allocation13_spill]] %s1290_s2 }
   0x4   :  { %1313 = sst [smem:[#allocation14_spill]] %s1291_s3 }
   0x5   :  { %24 = vsyncpa [#allocation3], 0 }
   0x6   :  { %25 = vsyncpa [#allocation6], 0 }
   0x7   :  { %26 = vsyncpa [#allocation4], 0  ;;  %s51_s20 = sshll.u32 %s1298_s10, 4  ;;  %s800_s21 = smov [#allocation2]   ;;  %s52_s20 = int_to_ptr.hbm [resolvable:$true] %s51_s20 }
   0x8   :  { %s53_s1 = sshll.u32 %s800_s21, 4  ;;  %s74_s23 = sshll.u32 %s1304_s16, 4  ;;  %s54_s1 = int_to_ptr.vmem [resolvable:$true] %s53_s1  ;;  %s75_s23 = int_to_ptr.hbm [resolvable:$true] %s74_s23 }
   0x9   :  { %s801_s24 = smov 128   ;;  %s802_s25 = smov 8  }
   0xa   :  { %59 = dma.hbm_to_vmem [thread:$0]  %s52_s20, 2048, %s54_s1, [#allocation3], %s801_s24, %s801_s24, %s802_s25  }
   0xb   :  { %s803_s3 = smov [#allocation5]  }
   0xc   :  { %s76_s26 = sshll.u32 %s803_s3, 4  ;;  %s77_s26 = int_to_ptr.vmem [resolvable:$true] %s76_s26 }
   0xd   :  { %82 = dma.hbm_to_vmem [thread:$0]  %s75_s23, 256, %s77_s26, [#allocation6], %s801_s24, %s801_s24, %s802_s25  }
   0xe   :  { %794 = dma.done.wait [#allocation3], 2048  }
   0xf   :  { %795 = vsyncadd [#allocation3], 4294965248 }
  0x10   :  { %796 = dma.done.wait [#allocation6], 256  }
  0x11   :  { %797 = vsyncadd [#allocation6], 4294967040  ;;  %s1314_s28 = sld [smem:[#allocation12_spill]]  ;;  %v926_v4 = vld [vmem:[%s1295_s7 + $0x78] sm:$0xff]  ;;  %v935_v6 = vld [vmem:[%s1295_s7 + $0x70] sm:$0xff]  ;;  %vm176_vm0 = vcmask 1041408  }
  0x12   :  { %200 = vmatpush.msra.mxu2 %v926_v4  ;;  %v943_v8 = vld [vmem:[%s1295_s7 + $0x68] sm:$0xff]  ;;  %v952_v10 = vld [vmem:[%s1295_s7 + $0x60] sm:$0xff]  ;;  %v958_v11 = vld [vmem:[%s1295_s7 + $0x58] sm:$0xff]  ;;  %s1315_s29 = sld [smem:[#allocation11_spill]]  ;;  %vm222_vm1 = vcmask 64512   ;;  %vm490_vm10 = vcmask 130048  }
  0x13   :  { %v194_v13 = vld [vmem:[%s1295_s7 + $0x50] sm:$0xff]  ;;  %v193_v15 = vld [vmem:[%s1295_s7 + $0x48] sm:$0xff]  ;;  %v192_v17 = vld [vmem:[%s1295_s7 + $0x40] sm:$0xff]  ;;  %s1316_s16 = sld [smem:[#allocation14_spill]]  ;;  %s804_s26 = smov [#allocation7]  }
  0x14   :  { %201 = vmatpush.msra.mxu2 %v935_v6  ;;  %v191_v25 = vld [vmem:[%s1295_s7 + $0x38] sm:$0xff]  ;;  %v190_v26 = vld [vmem:[%s1295_s7 + $0x30] sm:$0xff]  ;;  %v189_v27 = vld [vmem:[%s1295_s7 + $0x28] sm:$0xff]  ;;  %s679_s10 = sshll.u32 %s804_s26, 4  ;;  %s680_s10 = int_to_ptr.vmem [resolvable:$true] %s679_s10 }
  0x15   :  { %v188_v28 = vld [vmem:[%s1295_s7 + $0x20] sm:$0xff]  ;;  %v187_v29 = vld [vmem:[%s1295_s7 + $0x18] sm:$0xff]  ;;  %v186_v30 = vld [vmem:[%s1295_s7 + $0x10] sm:$0xff] }
  0x16   :  { %202 = vmatpush.msra.mxu2 %v943_v8  ;;  %v185_v31 = vld [vmem:[%s1295_s7 + $0x8] sm:$0xff]  ;;  %v184_v32 = vld [vmem:[%s1295_s7] sm:$0xff] }
  0x17   :  { %v111_v0 = vld [vmem:[%s1314_s28 + $0x78] sm:$0xff]  ;;  %v110_v1 = vld [vmem:[%s1314_s28 + $0x70] sm:$0xff]  ;;  %v109_v2 = vld [vmem:[%s1314_s28 + $0x68] sm:$0xff] }
  0x18   :  { %116 = vmatpush.msra.mxu0 %v111_v0  ;;  %v108_v3 = vld [vmem:[%s1314_s28 + $0x60] sm:$0xff]  ;;  %v107_v5 = vld [vmem:[%s1314_s28 + $0x58] sm:$0xff]  ;;  %v106_v7 = vld [vmem:[%s1314_s28 + $0x50] sm:$0xff]  ;;  %203 = vmatpush.msra.mxu2 %v952_v10 }
  0x19   :  { %v105_v9 = vld [vmem:[%s1314_s28 + $0x48] sm:$0xff]  ;;  %v104_v12 = vld [vmem:[%s1314_s28 + $0x40] sm:$0xff]  ;;  %v103_v14 = vld [vmem:[%s1314_s28 + $0x38] sm:$0xff] }
  0x1a   :  { %117 = vmatpush.msra.mxu0 %v110_v1  ;;  %204 = vmatpush.msra.mxu2 %v958_v11  ;;  %v102_v16 = vld [vmem:[%s1314_s28 + $0x30] sm:$0xff]  ;;  %v101_v18 = vld [vmem:[%s1314_s28 + $0x28] sm:$0xff]  ;;  %v100_v19 = vld [vmem:[%s1314_s28 + $0x20] sm:$0xff] }
  0x1b   :  { %v99_v20 = vld [vmem:[%s1314_s28 + $0x18] sm:$0xff]  ;;  %v98_v21 = vld [vmem:[%s1314_s28 + $0x10] sm:$0xff]  ;;  %v97_v22 = vld [vmem:[%s1314_s28 + $0x8] sm:$0xff] }
  0x1c   :  { %118 = vmatpush.msra.mxu0 %v109_v2  ;;  %205 = vmatpush.msra.mxu2 %v194_v13  ;;  %v96_v23 = vld [vmem:[%s1314_s28] sm:$0xff]  ;;  %s1317_s28 = sld [smem:[#allocation13_spill]] }
  0x1d   :  { %v1001_v24 = vld [vmem:[%s1315_s29] sm:$0x3] }
  0x1e   :  { %119 = vmatpush.msra.mxu0 %v108_v3  ;;  %206 = vmatpush.msra.mxu2 %v193_v15  ;;  %v701_v33 = vld [vmem:[%s1316_s16] ss:$0 sm:$0xff] }
  0x1f   :  { %v221_v43 = vld [vmem:[%s1296_s8] sm:$0xff] }
  0x20   :  { %120 = vmatpush.msra.mxu0 %v107_v5  ;;  %207 = vmatpush.msra.mxu2 %v192_v17 }
  0x21   :  { %241 = vmatpush.msra.mxu3 %v221_v43 }
  0x22   :  { %121 = vmatpush.msra.mxu0 %v106_v7  ;;  %208 = vmatpush.msra.mxu2 %v191_v25  ;;  %v151_v57 = vld [vmem:[%s1317_s28 + $0x78] sm:$0xff]  ;;  %v150_v58 = vld [vmem:[%s1317_s28 + $0x70] sm:$0xff]  ;;  %v149_v59 = vld [vmem:[%s1317_s28 + $0x68] sm:$0xff] }
  0x23   :  { %256 = vmatpush.msrb.mxu3 %v926_v4  ;;  %156 = vmatpush.msra.mxu1 %v151_v57  ;;  %v148_v60 = vld [vmem:[%s1317_s28 + $0x60] sm:$0xff]  ;;  %v147_v61 = vld [vmem:[%s1317_s28 + $0x58] sm:$0xff]  ;;  %v146_v62 = vld [vmem:[%s1317_s28 + $0x50] sm:$0xff] }
  0x24   :  { %122 = vmatpush.msra.mxu0 %v105_v9  ;;  %209 = vmatpush.msra.mxu2 %v190_v26  ;;  %v145_v1 = vld [vmem:[%s1317_s28 + $0x48] sm:$0xff]  ;;  %v144_v3 = vld [vmem:[%s1317_s28 + $0x40] sm:$0xff]  ;;  %v143_v4 = vld [vmem:[%s1317_s28 + $0x38] sm:$0xff] }
  0x25   :  { %257 = vmatpush.msrb.mxu3 %v935_v6  ;;  %157 = vmatpush.msra.mxu1 %v150_v58  ;;  %v142_v5 = vld [vmem:[%s1317_s28 + $0x30] sm:$0xff]  ;;  %v141_v6 = vld [vmem:[%s1317_s28 + $0x28] sm:$0xff] }
  0x26   :  { %123 = vmatpush.msra.mxu0 %v104_v12  ;;  %210 = vmatpush.msra.mxu2 %v189_v27  ;;  %v138_v12 = vld [vmem:[%s1317_s28 + $0x10] sm:$0xff] }
  0x27   :  { %258 = vmatpush.msrb.mxu3 %v943_v8  ;;  %158 = vmatpush.msra.mxu1 %v149_v59  ;;  %v140_v8 = vld [vmem:[%s1317_s28 + $0x20] sm:$0xff] }
  0x28   :  { %124 = vmatpush.msra.mxu0 %v103_v14  ;;  %211 = vmatpush.msra.mxu2 %v188_v28  ;;  %v137_v14 = vld [vmem:[%s1317_s28 + $0x8] sm:$0xff] }
  0x29   :  { %259 = vmatpush.msrb.mxu3 %v952_v10  ;;  %159 = vmatpush.msra.mxu1 %v148_v60  ;;  %v139_v10 = vld [vmem:[%s1317_s28 + $0x18] sm:$0xff] }
  0x2a   :  { %125 = vmatpush.msra.mxu0 %v102_v16  ;;  %212 = vmatpush.msra.mxu2 %v187_v29  ;;  %v136_v16 = vld [vmem:[%s1317_s28] sm:$0xff] }
  0x2b   :  { %260 = vmatpush.msrb.mxu3 %v958_v11  ;;  %160 = vmatpush.msra.mxu1 %v147_v61 }
  0x2c   :  { %126 = vmatpush.msra.mxu0 %v101_v18  ;;  %213 = vmatpush.msra.mxu2 %v186_v30 }
  0x2d   :  { %261 = vmatpush.msrb.mxu3 %v194_v13  ;;  %161 = vmatpush.msra.mxu1 %v146_v62  ;;  %v366_v62 = vld [vmem:[%s1297_s9 + $0x10] sm:$0xff] }
  0x2e   :  { %127 = vmatpush.msra.mxu0 %v100_v19  ;;  %214 = vmatpush.msra.mxu2 %v185_v31  ;;  %v379_v19 = vld [vmem:[%s1297_s9 + $0x78] sm:$0xff] }
  0x2f   :  { %262 = vmatpush.msrb.mxu3 %v193_v15  ;;  %162 = vmatpush.msra.mxu1 %v145_v1  ;;  %v365_v1 = vld [vmem:[%s1297_s9 + $0x8] sm:$0xff] }
  0x30   :  { %128 = vmatpush.msra.mxu0 %v99_v20  ;;  %215 = vmatpush.msra.mxu2 %v184_v32  ;;  %v419_v20 = vld [vmem:[#allocation2 + $0x78] sm:$0xff] }
  0x31   :  { %263 = vmatpush.msrb.mxu3 %v192_v17  ;;  %163 = vmatpush.msra.mxu1 %v144_v3 }
  0x32   :  { %129 = vmatpush.msra.mxu0 %v98_v21  ;;  %v378_v21 = vld [vmem:[%s1297_s9 + $0x70] sm:$0xff]  ;;  %424 = vmatpush.msrb.mxu2 %v419_v20 }
  0x33   :  { %264 = vmatpush.msrb.mxu3 %v191_v25  ;;  %164 = vmatpush.msra.mxu1 %v143_v4  ;;  %v417_v25 = vld [vmem:[#allocation2 + $0x68] sm:$0xff]  ;;  %v364_v4 = vld [vmem:[%s1297_s9] sm:$0xff]  ;;  %v461_v20 = vld [vmem:[%s1303_s15 + $0x50] sm:$0xff] }
  0x34   :  { %130 = vmatpush.msra.mxu0 %v97_v22  ;;  %v418_v22 = vld [vmem:[#allocation2 + $0x70] sm:$0xff] }
  0x35   :  { %265 = vmatpush.msrb.mxu3 %v190_v26  ;;  %165 = vmatpush.msra.mxu1 %v142_v5  ;;  %v416_v26 = vld [vmem:[#allocation2 + $0x60] sm:$0xff] }
  0x36   :  { %131 = vmatpush.msra.mxu0 %v96_v23  ;;  %v377_v23 = vld [vmem:[%s1297_s9 + $0x68] sm:$0xff]  ;;  %425 = vmatpush.msrb.mxu2 %v418_v22  ;;  %v404_v5 = vld [vmem:[#allocation2] sm:$0xff] }
  0x37   :  { %132 = vmatmul.f32.vlgmr.msra.gmra.mxu0 %v1001_v24  ;;  %266 = vmatpush.msrb.mxu3 %v189_v27  ;;  %v460_v22 = vld [vmem:[%s1303_s15 + $0x48] sm:$0xff] }
  0x38   :  { %306 = vmatpush.msrb.mxu0 %v221_v43  ;;  %166 = vmatpush.msra.mxu1 %v141_v6  ;;  %v411_v43 = vld [vmem:[#allocation2 + $0x38] sm:$0xff] }
  0x39   :  { %267 = vmatpush.msrb.mxu3 %v188_v28  ;;  %426 = vmatpush.msrb.mxu2 %v417_v25  ;;  %v375_v28 = vld [vmem:[%s1297_s9 + $0x58] sm:$0xff]  ;;  %v459_v25 = vld [vmem:[%s1303_s15 + $0x40] sm:$0xff] }
  0x3a   :  { %167 = vmatpush.msra.mxu1 %v140_v8 }
  0x3b   :  { %268 = vmatpush.msrb.mxu3 %v187_v29  ;;  %v415_v29 = vld [vmem:[#allocation2 + $0x58] sm:$0xff]  ;;  %427 = vmatpush.msrb.mxu2 %v416_v26 }
  0x3c   :  { %168 = vmatpush.msra.mxu1 %v139_v10  ;;  %v1165_v10 = vld [vmem:[%s1303_s15 + $0x70] sm:$0xff] }
  0x3d   :  { %269 = vmatpush.msrb.mxu3 %v186_v30  ;;  %428 = vmatpush.msrb.mxu2 %v415_v29 }
  0x3e   :  { %169 = vmatpush.msra.mxu1 %v138_v12  ;;  %v464_v12 = vld [vmem:[%s1303_s15 + $0x68] sm:$0xff] }
  0x3f   :  { %270 = vmatpush.msrb.mxu3 %v185_v31  ;;  %v702_v31 = vld [vmem:[%s1293_s5] ss:$0 sm:$0xff] }
  0x40   :  { %170 = vmatpush.msra.mxu1 %v137_v14 }
  0x41   :  { %271 = vmatpush.msrb.mxu3 %v184_v32  ;;  %v374_v32 = vld [vmem:[%s1297_s9 + $0x50] sm:$0xff] }
  0x42   :  { %171 = vmatpush.msra.mxu1 %v136_v16 }
  0x43   :  { %172 = vmatmul.f32.vlgmr.msra.gmra.mxu1 %v1001_v24  ;;  %v376_v24 = vld [vmem:[%s1297_s9 + $0x60] sm:$0xff] }
  0x44   :  { %384 = vmatpush.msrb.mxu1 %v379_v19 }
  0x46   :  { %385 = vmatpush.msrb.mxu1 %v378_v21 }
  0x48   :  { %386 = vmatpush.msrb.mxu1 %v377_v23 }
  0x4a   :  { %387 = vmatpush.msrb.mxu1 %v376_v24 }
  0x4c   :  { %388 = vmatpush.msrb.mxu1 %v375_v28 }
  0x4e   :  { %389 = vmatpush.msrb.mxu1 %v374_v32 }
  0xb4   :  { %v133_v34 = vpop.f32.mrf.mxu0 }
  0xb5   :  { %v134_v35 = vadd.f32 %v701_v33, %v133_v34  ;;  %v414_v33 = vld [vmem:[#allocation2 + $0x50] sm:$0xff] }
  0xb6   :  { %429 = vmatpush.msrb.mxu2 %v414_v33 }
  0xb7   :  { %v177_v36 = vsel %vm176_vm0, %v134_v35, 0.0 }
  0xb8   :  { %v178_v37 = vrot.slane %v177_v36, 4 }
  0xba   :  { %v179_v38 = vadd.f32 %v178_v37, %v177_v36  ;;  %v373_v36 = vld [vmem:[%s1297_s9 + $0x48] sm:$0xff] }
  0xbb   :  { %v413_v37 = vld [vmem:[#allocation2 + $0x48] sm:$0xff]  ;;  %390 = vmatpush.msrb.mxu1 %v373_v36 }
  0xbc   :  { %v180_v39 = vrot.slane %v179_v38, 2  ;;  %430 = vmatpush.msrb.mxu2 %v413_v37 }
  0xbe   :  { %v181_v40 = vadd.f32 %v180_v39, %v179_v38  ;;  %v372_v39 = vld [vmem:[%s1297_s9 + $0x40] sm:$0xff] }
  0xbf   :  { %391 = vmatpush.msrb.mxu1 %v372_v39 }
  0xc0   :  { %v182_v41 = vrot.slane %v181_v40, 1  ;;  %v173_v32 = vpop.f32.mrf.mxu1 }
  0xc2   :  { %v183_v42 = vadd.f32 %v182_v41, %v181_v40  ;;  %v412_v40 = vld [vmem:[#allocation2 + $0x40] sm:$0xff] }
  0xc3   :  { %431 = vmatpush.msrb.mxu2 %v412_v40  ;;  %v458_v40 = vld [vmem:[%s1303_s15 + $0x38] sm:$0xff] }
  0xc4   :  { %216 = vmatmul.f32.vlgmr.msra.gmra.mxu2 %v183_v42  ;;  %v371_v42 = vld [vmem:[%s1297_s9 + $0x38] sm:$0xff] }
  0xc5   :  { %392 = vmatpush.msrb.mxu1 %v371_v42  ;;  %432 = vmatpush.msrb.mxu2 %v411_v43  ;;  %v457_v42 = vld [vmem:[%s1303_s15 + $0x30] sm:$0xff]  ;;  %v456_v43 = vld [vmem:[%s1303_s15 + $0x28] sm:$0xff] }
 0x147   :  { %v217_v44 = vpop.f32.mrf.mxu2 }
 0x148   :  { %v220_v45 = vmul.f32 0.03125, %v217_v44 }
 0x14a   :  { %692 = vmatmul.msk.f32.vlgmr.msra.gmra.mxu3 %vm222_vm1, %v220_v45  ;;  %v370_v45 = vld [vmem:[%s1297_s9 + $0x30] sm:$0xff] }
 0x14b   :  { %393 = vmatpush.msrb.mxu1 %v370_v45  ;;  %v453_v45 = vld [vmem:[%s1303_s15 + $0x10] sm:$0xff] }
 0x1cd   :  { %v243_v46 = vpop.f32.mrf.mxu3 }
 0x1ce   :  { %v246_v47 = vperm.slane %v243_v46, 0  ;;  %v410_v46 = vld [vmem:[#allocation2 + $0x30] sm:$0xff] }
 0x1cf   :  { %433 = vmatpush.msrb.mxu2 %v410_v46  ;;  %v452_v46 = vld [vmem:[%s1303_s15 + $0x8] sm:$0xff] }
 0x1d0   :  { %v1041_v48 = vsub.f32 %v134_v35, %v246_v47  ;;  %v703_v35 = vld [vmem:[%s1294_s6] ss:$0 sm:$0xff] }
 0x1d2   :  { %v248_v49 = vmul.f32 %v1041_v48, %v1041_v48 }
 0x1d4   :  { %v249_v50 = vsel %vm176_vm0, %v248_v49, 0.0  ;;  %v409_v49 = vld [vmem:[#allocation2 + $0x28] sm:$0xff] }
 0x1d5   :  { %v250_v51 = vrot.slane %v249_v50, 4  ;;  %434 = vmatpush.msrb.mxu2 %v409_v49  ;;  %v488_v49 = vld [vmem:[#allocation5] sm:$0xff] }
 0x1d7   :  { %v251_v52 = vadd.f32 %v250_v51, %v249_v50  ;;  %v368_v51 = vld [vmem:[%s1297_s9 + $0x20] sm:$0xff] }
 0x1d9   :  { %v252_v53 = vrot.slane %v251_v52, 2 }
 0x1db   :  { %v253_v54 = vadd.f32 %v252_v53, %v251_v52  ;;  %v408_v52 = vld [vmem:[#allocation2 + $0x20] sm:$0xff] }
 0x1dc   :  { %435 = vmatpush.msrb.mxu2 %v408_v52 }
 0x1dd   :  { %v254_v55 = vrot.slane %v253_v54, 1 }
 0x1df   :  { %v255_v56 = vadd.f32 %v254_v55, %v253_v54  ;;  %v367_v54 = vld [vmem:[%s1297_s9 + $0x18] sm:$0xff] }
 0x1e0   :  { %v407_v55 = vld [vmem:[#allocation2 + $0x18] sm:$0xff] }
 0x1e1   :  { %272 = vmatmul.f32.vlgmr.msrb.gmra.mxu3 %v255_v56  ;;  %436 = vmatpush.msrb.mxu2 %v407_v55 }
 0x264   :  { %v273_v63 = vpop.f32.mrf.mxu3 }
 0x265   :  { %v276_v0 = vmul.f32 0.03125, %v273_v63  ;;  %v406_v63 = vld [vmem:[#allocation2 + $0x10] sm:$0xff] }
 0x266   :  { %437 = vmatpush.msrb.mxu2 %v406_v63 }
 0x267   :  { %v277_v2 = vadd.f32 1e-05, %v276_v0 }
 0x269   :  { %710 = vrsqrt.f32 %v277_v2  ;;  %vm284_vm3 = vweird.f32 %v277_v2 }
 0x26f   :  { %v711_v7 = vpop.eup %710 }
 0x270   :  { %v279_v9 = vmul.f32 %v711_v7, %v277_v2  ;;  %vm285_vm2 = vweird.f32 %v711_v7  ;;  %v405_v2 = vld [vmem:[#allocation2 + $0x8] sm:$0xff] }
 0x271   :  { %vm286_vm4 = vmor %vm284_vm3, %vm285_vm2  ;;  %438 = vmatpush.msrb.mxu2 %v405_v2  ;;  %vm672_vm3 = vcmask 254976  }
 0x272   :  { %v280_v11 = vmul.f32 %v711_v7, %v279_v9  ;;  %v1160_v9 = vld [vmem:[%s1303_s15 + $0x78] sm:$0xff] }
 0x273   :  { %439 = vmatpush.msrb.mxu2 %v404_v5  ;;  %467 = vmatpush.msra.mxu3 %v1160_v9 }
 0x274   :  { %v281_v13 = vmul.f32 0.5, %v280_v11 }
 0x275   :  { %468 = vmatpush.msra.mxu3 %v1165_v10 }
 0x276   :  { %v282_v15 = vsub.f32 1.5, %v281_v13 }
 0x277   :  { %469 = vmatpush.msra.mxu3 %v464_v12 }
 0x278   :  { %v283_v17 = vmul.f32 %v711_v7, %v282_v15  ;;  %v463_v15 = vld [vmem:[%s1303_s15 + $0x60] sm:$0xff] }
 0x279   :  { %470 = vmatpush.msra.mxu3 %v463_v15 }
 0x27a   :  { %v287_v18 = vsel %vm286_vm4, %v711_v7, %v283_v17  ;;  %v462_v17 = vld [vmem:[%s1303_s15 + $0x58] sm:$0xff] }
 0x27b   :  { %693 = vmatmul.msk.f32.vlgmr.msrb.gmra.mxu0 %vm222_vm1, %v287_v18  ;;  %471 = vmatpush.msra.mxu3 %v462_v17 }
 0x27d   :  { %472 = vmatpush.msra.mxu3 %v461_v20 }
 0x27f   :  { %473 = vmatpush.msra.mxu3 %v460_v22 }
 0x281   :  { %474 = vmatpush.msra.mxu3 %v459_v25 }
 0x283   :  { %475 = vmatpush.msra.mxu3 %v458_v40 }
 0x285   :  { %476 = vmatpush.msra.mxu3 %v457_v42 }
 0x287   :  { %477 = vmatpush.msra.mxu3 %v456_v43 }
 0x2f8   :  { %v308_v27 = vpop.f32.mrf.mxu0 }
 0x2f9   :  { %v311_v30 = vperm.slane %v308_v27, 0 }
 0x2fb   :  { %v312_v34 = vmul.f32 %v311_v30, %v1041_v48  ;;  %v369_v48 = vld [vmem:[%s1297_s9 + $0x28] sm:$0xff]  ;;  %s681_s9 = sshll.u32 %s1307_s19, 4  ;;  %s682_s9 = int_to_ptr.hbm [resolvable:$true] %s681_s9 }
 0x2fc   :  { %394 = vmatpush.msrb.mxu1 %v369_v48  ;;  %v489_v48 = vld [vmem:[#allocation5 + $0x8] sm:$0xff] }
 0x2fd   :  { %v317_v38 = vmul.f32 %v702_v31, %v312_v34  ;;  %v704_v31 = vld [vmem:[%s1292_s4] ss:$0 sm:$0xff]  ;;  %508 = vmatpush.msra.mxu0 %v489_v48 }
 0x2fe   :  { %395 = vmatpush.msrb.mxu1 %v368_v51 }
 0x2ff   :  { %v1127_v41 = vadd.f32 %v703_v35, %v317_v38  ;;  %v174_v35 = vadd.f32 %v704_v31, %v173_v32  ;;  %509 = vmatpush.msra.mxu0 %v488_v49  ;;  %v641_v31 = vld [vmem:[%s1305_s17 + $0x48] sm:$0xff] }
 0x300   :  { %396 = vmatpush.msrb.mxu1 %v367_v54 }
 0x301   :  { %v1133_v44 = vmul.f32 0.70710677, %v1127_v41  ;;  %v323_v36 = vmul.f32 0.5, %v1127_v41  ;;  %v455_v41 = vld [vmem:[%s1303_s15 + $0x20] sm:$0xff]  ;;  %524 = vmatpush.msrb.mxu0 %v1160_v9 }
 0x302   :  { %397 = vmatpush.msrb.mxu1 %v366_v62  ;;  %478 = vmatpush.msra.mxu3 %v455_v41 }
 0x303   :  { %v325_v47 = vand.u32 2147483647, %v1133_v44  ;;  %vm358_vm9 = vcmp.ge.f32.partialorder %v1133_v44, 0.0  ;;  %v454_v44 = vld [vmem:[%s1303_s15 + $0x18] sm:$0xff]  ;;  %525 = vmatpush.msrb.mxu0 %v1165_v10 }
 0x304   :  { %398 = vmatpush.msrb.mxu1 %v365_v1  ;;  %479 = vmatpush.msra.mxu3 %v454_v44 }
 0x305   :  { %v326_v50 = vmul.f32 0.3275911, %v325_v47  ;;  %v352_v7 = vsub.f32 0.0, %v325_v47  ;;  %526 = vmatpush.msrb.mxu0 %v464_v12 }
 0x306   :  { %399 = vmatpush.msrb.mxu1 %v364_v4  ;;  %480 = vmatpush.msra.mxu3 %v453_v45 }
 0x307   :  { %v327_v53 = vadd.f32 1.0, %v326_v50  ;;  %v353_v14 = vmul.f32 %v352_v7, %v325_v47  ;;  %v451_v47 = vld [vmem:[%s1303_s15] sm:$0xff]  ;;  %527 = vmatpush.msrb.mxu0 %v463_v15 }
 0x308   :  { %481 = vmatpush.msra.mxu3 %v452_v46  ;;  %573 = vmatpush.msra.mxu1 %v489_v48  ;;  %v705_v50 = vld [vmem:[%s1299_s11] ss:$0 sm:$0xff] }
 0x309   :  { %712 = vrcp.f32 %v327_v53  ;;  %v339_v59 = vand.u32 2147483648, %v327_v53  ;;  %v337_v61 = vand.u32 2147483647, %v327_v53  ;;  %vm333_vm6 = vweird.f32 %v327_v53  ;;  %528 = vmatpush.msrb.mxu0 %v462_v17 }
 0x30a   :  { %v354_v19 = vmul.f32 1.442695, %v353_v14  ;;  %482 = vmatpush.msra.mxu3 %v451_v47  ;;  %574 = vmatpush.msra.mxu1 %v488_v49 }
 0x30b   :  { %v340_v3 = vor.u32 1.1754944e-38, %v339_v59  ;;  %vm338_vm8 = vcmp.eq.f32.partialorder %v337_v61, 8.507059e+37  ;;  %529 = vmatpush.msrb.mxu0 %v461_v20  ;;  %v646_v20 = vld [vmem:[%s1305_s17 + $0x70] sm:$0xff] }
 0x30c   :  { %714 = vpow2.f32 %v354_v19  ;;  %v647_v19 = vld [vmem:[%s1305_s17 + $0x78] sm:$0xff] }
 0x30d   :  { %530 = vmatpush.msrb.mxu0 %v460_v22  ;;  %652 = vmatpush.msra.mxu2 %v647_v19 }
 0x30f   :  { %v713_v56 = vpop.eup %712  ;;  %531 = vmatpush.msrb.mxu0 %v459_v25  ;;  %653 = vmatpush.msra.mxu2 %v646_v20 }
 0x310   :  { %v329_v57 = vmul.f32 %v713_v56, %v327_v53  ;;  %vm334_vm5 = vweird.f32 %v713_v56 }
 0x311   :  { %vm335_vm7 = vmor %vm333_vm6, %vm334_vm5  ;;  %532 = vmatpush.msrb.mxu0 %v458_v40 }
 0x312   :  { %v330_v58 = vsub.f32 1.0, %v329_v57  ;;  %v715_v28 = vpop.eup %714 }
 0x313   :  { %533 = vmatpush.msrb.mxu0 %v457_v42  ;;  %v636_v42 = vld [vmem:[%s1305_s17 + $0x20] sm:$0xff] }
 0x314   :  { %v331_v60 = vmul.f32 %v713_v56, %v330_v58 }
 0x315   :  { %534 = vmatpush.msrb.mxu0 %v456_v43  ;;  %v635_v43 = vld [vmem:[%s1305_s17 + $0x18] sm:$0xff] }
 0x316   :  { %v332_v0 = vadd.f32 %v713_v56, %v331_v60 }
 0x317   :  { %535 = vmatpush.msrb.mxu0 %v455_v41  ;;  %v634_v41 = vld [vmem:[%s1305_s17 + $0x10] sm:$0xff] }
 0x318   :  { %v336_v6 = vsel %vm335_vm7, %v713_v56, %v332_v0 }
 0x319   :  { %v341_v8 = vsel %vm338_vm8, %v340_v3, %v336_v6  ;;  %536 = vmatpush.msrb.mxu0 %v454_v44  ;;  %v633_v44 = vld [vmem:[%s1305_s17 + $0x8] sm:$0xff] }
 0x31a   :  { %v343_v11 = vmul.f32 1.0614054, %v341_v8 }
 0x31b   :  { %537 = vmatpush.msrb.mxu0 %v453_v45 }
 0x31c   :  { %v344_v13 = vadd.f32 -1.4531521, %v343_v11 }
 0x31d   :  { %538 = vmatpush.msrb.mxu0 %v452_v46 }
 0x31e   :  { %v345_v16 = vmul.f32 %v344_v13, %v341_v8 }
 0x31f   :  { %539 = vmatpush.msrb.mxu0 %v451_v47  ;;  %v632_v47 = vld [vmem:[%s1305_s17] sm:$0xff] }
 0x320   :  { %v346_v18 = vadd.f32 1.4214138, %v345_v16 }
 0x322   :  { %v347_v21 = vmul.f32 %v346_v18, %v341_v8 }
 0x324   :  { %v348_v23 = vadd.f32 -0.28449672, %v347_v21  ;;  %v645_v21 = vld [vmem:[%s1305_s17 + $0x68] sm:$0xff] }
 0x325   :  { %654 = vmatpush.msra.mxu2 %v645_v21 }
 0x326   :  { %v349_v24 = vmul.f32 %v348_v23, %v341_v8  ;;  %v644_v23 = vld [vmem:[%s1305_s17 + $0x60] sm:$0xff] }
 0x327   :  { %655 = vmatpush.msra.mxu2 %v644_v23 }
 0x328   :  { %v350_v26 = vadd.f32 0.2548296, %v349_v24  ;;  %v707_v24 = vld [vmem:[%s1301_s13] ss:$0 sm:$0xff] }
 0x32a   :  { %v351_v27 = vmul.f32 %v350_v26, %v341_v8  ;;  %v643_v26 = vld [vmem:[%s1305_s17 + $0x58] sm:$0xff] }
 0x32b   :  { %656 = vmatpush.msra.mxu2 %v643_v26 }
 0x32c   :  { %v356_v29 = vmul.f32 %v715_v28, %v351_v27  ;;  %v708_v28 = vld [vmem:[%s1302_s14] ss:$0 sm:$0xff] }
 0x32e   :  { %v357_v30 = vsub.f32 1.0, %v356_v29  ;;  %v642_v29 = vld [vmem:[%s1305_s17 + $0x50] sm:$0xff] }
 0x32f   :  { %657 = vmatpush.msra.mxu2 %v642_v29 }
 0x330   :  { %v359_v33 = vsub.f32 0.0, %v357_v30 }
 0x331   :  { %658 = vmatpush.msra.mxu2 %v641_v31 }
 0x332   :  { %v360_v34 = vsel %vm358_vm9, %v357_v30, %v359_v33  ;;  %v640_v33 = vld [vmem:[%s1305_s17 + $0x40] sm:$0xff] }
 0x333   :  { %v361_v37 = vadd.f32 1.0, %v360_v34  ;;  %659 = vmatpush.msra.mxu2 %v640_v33 }
 0x335   :  { %v362_v38 = vmul.f32 %v361_v37, %v323_v36  ;;  %v638_v37 = vld [vmem:[%s1305_s17 + $0x30] sm:$0xff] }
 0x337   :  { %v363_v39 = vadd.f32 %v362_v38, %v174_v35  ;;  %v639_v35 = vld [vmem:[%s1305_s17 + $0x38] sm:$0xff] }
 0x338   :  { %660 = vmatpush.msra.mxu2 %v639_v35 }
 0x339   :  { %400 = vmatmul.f32.vlgmr.msrb.gmra.mxu1 %v363_v39  ;;  %440 = vmatmul.f32.vlgmr.msrb.gmra.mxu2 %v363_v39  ;;  %v637_v39 = vld [vmem:[%s1305_s17 + $0x28] sm:$0xff] }
 0x33a   :  { %661 = vmatpush.msra.mxu2 %v638_v37 }
 0x33c   :  { %662 = vmatpush.msra.mxu2 %v637_v39 }
 0x33e   :  { %663 = vmatpush.msra.mxu2 %v636_v42 }
 0x340   :  { %664 = vmatpush.msra.mxu2 %v635_v43 }
 0x342   :  { %665 = vmatpush.msra.mxu2 %v634_v41 }
 0x344   :  { %666 = vmatpush.msra.mxu2 %v633_v44 }
 0x346   :  { %667 = vmatpush.msra.mxu2 %v632_v47 }
 0x3b6   :  { %v401_v51 = vpop.f32.mrf.mxu1 }
 0x3b7   :  { %v402_v52 = vadd.f32 %v705_v50, %v401_v51 }
 0x3b9   :  { %v444_v53 = vsel %vm176_vm0, %v402_v52, 0.0 }
 0x3ba   :  { %v445_v54 = vrot.slane %v444_v53, 4 }
 0x3bc   :  { %v446_v55 = vadd.f32 %v445_v54, %v444_v53 }
 0x3be   :  { %v447_v56 = vrot.slane %v446_v55, 2 }
 0x3c0   :  { %v448_v57 = vadd.f32 %v447_v56, %v446_v55 }
 0x3c2   :  { %v449_v58 = vrot.slane %v448_v57, 1 }
 0x3c4   :  { %v450_v59 = vadd.f32 %v449_v58, %v448_v57 }
 0x3c6   :  { %483 = vmatmul.f32.vlgmr.msra.gmra.mxu3 %v450_v59 }
 0x449   :  { %v484_v60 = vpop.f32.mrf.mxu3 }
 0x44a   :  { %v487_v61 = vmul.f32 0.0625, %v484_v60 }
 0x44c   :  { %694 = vmatmul.msk.f32.vlgmr.msra.gmra.mxu0 %vm490_vm10, %v487_v61 }
 0x4c9   :  { %v511_v62 = vpop.f32.mrf.mxu0 }
 0x4ca   :  { %v514_v63 = vperm.slane %v511_v62, 0 }
 0x4cc   :  { %v515_v0 = vsub.f32 %v402_v52, %v514_v63 }
 0x4ce   :  { %v516_v1 = vmul.f32 %v515_v0, %v515_v0 }
 0x4d0   :  { %v517_v2 = vsel %vm176_vm0, %v516_v1, 0.0 }
 0x4d1   :  { %v518_v3 = vrot.slane %v517_v2, 4 }
 0x4d3   :  { %v519_v4 = vadd.f32 %v518_v3, %v517_v2 }
 0x4d5   :  { %v520_v5 = vrot.slane %v519_v4, 2 }
 0x4d7   :  { %v521_v6 = vadd.f32 %v520_v5, %v519_v4 }
 0x4d9   :  { %v522_v7 = vrot.slane %v521_v6, 1 }
 0x4db   :  { %v523_v8 = vadd.f32 %v522_v7, %v521_v6 }
 0x4dd   :  { %540 = vmatmul.f32.vlgmr.msrb.gmra.mxu0 %v523_v8  ;;  %v706_v8 = vld [vmem:[%s1300_s12] ss:$0 sm:$0xff] }
 0x55a   :  { %v541_v9 = vpop.f32.mrf.mxu0 }
 0x55b   :  { %v544_v10 = vmul.f32 0.0625, %v541_v9  ;;  %v441_v9 = vpop.f32.mrf.mxu2 }
 0x55d   :  { %v545_v11 = vadd.f32 1e-05, %v544_v10 }
 0x55f   :  { %716 = vrsqrt.f32 %v545_v11  ;;  %vm552_vm12 = vweird.f32 %v545_v11 }
 0x565   :  { %v717_v12 = vpop.eup %716 }
 0x566   :  { %v547_v13 = vmul.f32 %v717_v12, %v545_v11  ;;  %vm553_vm11 = vweird.f32 %v717_v12 }
 0x567   :  { %vm554_vm13 = vmor %vm552_vm12, %vm553_vm11 }
 0x568   :  { %v548_v14 = vmul.f32 %v717_v12, %v547_v13  ;;  %v442_v13 = vadd.f32 %v706_v8, %v441_v9 }
 0x56a   :  { %v549_v15 = vmul.f32 0.5, %v548_v14 }
 0x56c   :  { %v550_v16 = vsub.f32 1.5, %v549_v15 }
 0x56e   :  { %v551_v17 = vmul.f32 %v717_v12, %v550_v16  ;;  %v709_v16 = vld [vmem:[%s1306_s18] ss:$0 sm:$0xff] }
 0x570   :  { %v555_v18 = vsel %vm554_vm13, %v717_v12, %v551_v17 }
 0x571   :  { %695 = vmatmul.msk.f32.vlgmr.msra.gmra.mxu1 %vm490_vm10, %v555_v18 }
 0x5ee   :  { %v576_v22 = vpop.f32.mrf.mxu1 }
 0x5ef   :  { %v579_v25 = vperm.slane %v576_v22, 0 }
 0x5f1   :  { %v580_v27 = vmul.f32 %v579_v25, %v515_v0 }
 0x5f3   :  { %v585_v30 = vmul.f32 %v707_v24, %v580_v27 }
 0x5f5   :  { %v590_v32 = vadd.f32 %v708_v28, %v585_v30 }
 0x5f7   :  { %v592_v34 = vmul.f32 0.70710677, %v590_v32  ;;  %v591_v11 = vmul.f32 0.5, %v590_v32 }
 0x5f9   :  { %v593_v36 = vand.u32 2147483647, %v592_v34  ;;  %vm626_vm2 = vcmp.ge.f32.partialorder %v592_v34, 0.0 }
 0x5fb   :  { %v594_v38 = vmul.f32 0.3275911, %v593_v36  ;;  %v620_v55 = vsub.f32 0.0, %v593_v36 }
 0x5fd   :  { %v595_v40 = vadd.f32 1.0, %v594_v38  ;;  %v621_v59 = vmul.f32 %v620_v55, %v593_v36 }
 0x5ff   :  { %718 = vrcp.f32 %v595_v40  ;;  %v607_v49 = vand.u32 2147483648, %v595_v40  ;;  %v605_v51 = vand.u32 2147483647, %v595_v40  ;;  %vm601_vm15 = vweird.f32 %v595_v40 }
 0x600   :  { %v622_v62 = vmul.f32 1.442695, %v621_v59 }
 0x601   :  { %v608_v53 = vor.u32 1.1754944e-38, %v607_v49  ;;  %vm606_vm1 = vcmp.eq.f32.partialorder %v605_v51, 8.507059e+37 }
 0x602   :  { %720 = vpow2.f32 %v622_v62 }
 0x605   :  { %v719_v45 = vpop.eup %718 }
 0x606   :  { %v597_v46 = vmul.f32 %v719_v45, %v595_v40  ;;  %vm602_vm14 = vweird.f32 %v719_v45 }
 0x607   :  { %vm603_vm0 = vmor %vm601_vm15, %vm602_vm14 }
 0x608   :  { %v598_v48 = vsub.f32 1.0, %v597_v46  ;;  %v721_v4 = vpop.eup %720 }
 0x60a   :  { %v599_v50 = vmul.f32 %v719_v45, %v598_v48 }
 0x60c   :  { %v600_v52 = vadd.f32 %v719_v45, %v599_v50 }
 0x60e   :  { %v604_v54 = vsel %vm603_vm0, %v719_v45, %v600_v52 }
 0x60f   :  { %v609_v56 = vsel %vm606_vm1, %v608_v53, %v604_v54 }
 0x610   :  { %v611_v57 = vmul.f32 1.0614054, %v609_v56 }
 0x612   :  { %v612_v58 = vadd.f32 -1.4531521, %v611_v57 }
 0x614   :  { %v613_v60 = vmul.f32 %v612_v58, %v609_v56 }
 0x616   :  { %v614_v61 = vadd.f32 1.4214138, %v613_v60 }
 0x618   :  { %v615_v63 = vmul.f32 %v614_v61, %v609_v56 }
 0x61a   :  { %v616_v0 = vadd.f32 -0.28449672, %v615_v63 }
 0x61c   :  { %v617_v1 = vmul.f32 %v616_v0, %v609_v56 }
 0x61e   :  { %v618_v2 = vadd.f32 0.2548296, %v617_v1 }
 0x620   :  { %v619_v3 = vmul.f32 %v618_v2, %v609_v56 }
 0x622   :  { %v624_v5 = vmul.f32 %v721_v4, %v619_v3 }
 0x624   :  { %v625_v6 = vsub.f32 1.0, %v624_v5 }
 0x626   :  { %v627_v7 = vsub.f32 0.0, %v625_v6 }
 0x628   :  { %v628_v10 = vsel %vm626_vm2, %v625_v6, %v627_v7 }
 0x629   :  { %v629_v12 = vadd.f32 1.0, %v628_v10 }
 0x62b   :  { %v630_v14 = vmul.f32 %v629_v12, %v591_v11 }
 0x62d   :  { %v631_v15 = vadd.f32 %v630_v14, %v442_v13 }
 0x62f   :  { %668 = vmatmul.f32.vlgmr.msra.gmra.mxu2 %v631_v15 }
 0x6b2   :  { %v669_v17 = vpop.f32.mrf.mxu2 }
 0x6b3   :  { %v670_v18 = vadd.f32 %v709_v16, %v669_v17 }
 0x6b5   :  { %673 = vst.msk [vmem:[#allocation7] sm:$0x3] %vm672_vm3, %v670_v18 }
 0x6b6   :  { %684 = dma.vmem_to_hbm [thread:$0]  %s680_s10, 32, %s682_s9, [#allocation4]  }
 0x6b7   :  { %798 = dma.done.wait [#allocation4], 32  }
 0x6b8   :  { %799 = vsyncadd [#allocation4], 4294967264 }
 0x6b9   :  { %689 = vsyncpa [#allocation3], 1 }
 0x6ba   :  { %690 = vsyncpa [#allocation6], 1 }
 0x6bb   :  { %691 = vsyncpa [#allocation4], 1 }

</bundles_post_ra>
